<compile_context>
chip_gen: v5e
topology: v5e:2x2
jax: 0.10.0
libtpu: 0.0.40
codegen_flags: <defaults>
</compile_context>

<pallas_src>
import functools

import jax
import jax.numpy as jnp
import numpy as np
from jax.experimental import pallas as pl
from jax.experimental.pallas import tpu as pltpu

EPS = 1e-5                                   # nn.BatchNorm2d default eps
_WEIGHT_VMEM_BUDGET = 6 * 1024 * 1024        # bf16 weight bytes held resident in pass 1
_VMEM_LIMIT = 48 * 1024 * 1024               # < v7x 64 MiB physical; > v5e 16 MiB default


def _round_up(x, m):
    return ((x + m - 1) // m) * m


def _choose_tm(M, tm_default=512):
    """M tile: <= tm_default, multiple of 8, and >= 2 tiles when M allows so both
    v7x TensorCores get work on the 'parallel' M axis."""
    tm = min(tm_default, _round_up(M, 8))
    if M > 8 and _round_up(M, tm) // tm < 2:
        tm = _round_up((M + 1) // 2, 8)
    return tm


# ---------------------------------------------------------------------------
# Pallas kernels
# ---------------------------------------------------------------------------
def matmul_stats_kernel(x_ref, w_ref, y_ref, stats_ref, acc_ref):
    """Tiled matmul with f32 accumulator; on the last K step store the result as
    bf16 and emit per-channel partial sum / sum-of-squares for this M tile."""
    k = pl.program_id(1)

    @pl.when(k == 0)
    def _():
        acc_ref[...] = jnp.zeros_like(acc_ref)

    acc_ref[...] += jnp.dot(x_ref[...], w_ref[...],
                            preferred_element_type=jnp.float32)

    @pl.when(k == pl.num_programs(1) - 1)
    def _():
        y = acc_ref[...]
        y_ref[...] = y.astype(y_ref.dtype)               # bf16 store (halves traffic)
        s1 = jnp.sum(y, axis=0, keepdims=True)           # (1, Co_p)
        s2 = jnp.sum(y * y, axis=0, keepdims=True)       # (1, Co_p)
        row = jax.lax.broadcasted_iota(jnp.int32, stats_ref.shape, 0)
        stats_ref[...] = jnp.where(row == 0, s1, jnp.where(row == 1, s2, 0.0))


def bn_apply_kernel(y_ref, sc_ref, sh_ref, o_ref, *, relu):
    out = y_ref[...].astype(jnp.float32) * sc_ref[...] + sh_ref[...]
    if relu:
        out = jnp.maximum(out, 0.0)
    o_ref[...] = out.astype(o_ref.dtype)


def bn_apply_res_kernel(y_ref, sc_ref, sh_ref, res_ref, rsc_ref, rsh_ref, o_ref):
    """Folded BN on the main stream + folded BN on the residual stream + add + ReLU.
    The extra FMA is free: pass 2 is load/store-slot bound, VPU has slack."""
    out = y_ref[...].astype(jnp.float32) * sc_ref[...] + sh_ref[...]
    out = out + res_ref[...].astype(jnp.float32) * rsc_ref[...] + rsh_ref[...]
    o_ref[...] = jnp.maximum(out, 0.0).astype(o_ref.dtype)


# ---------------------------------------------------------------------------
# pass 1: im2col matmul + per-tile channel stats
# ---------------------------------------------------------------------------
def matmul_stats(patches, w, *, tm):
    """patches: (M, K) bf16, w: (K, Co) f32.
    Returns y (M_p, Co_p) bf16, stats (num_m*8, Co_p) f32, Co_p."""
    M, K = patches.shape
    Co = w.shape[1]

    # lane-dense output channels; 256-aligned for the 2x256 MXU when Co is large
    Co_p = _round_up(Co, 256) if Co > 128 else _round_up(Co, 128)
    M_p = _round_up(M, tm)
    num_m = M_p // tm

    if K * Co_p * 2 <= _WEIGHT_VMEM_BUDGET:
        # single K block: constant weight block index -> weight DMA'd once.
        # K left unpadded (full-dim block is legal; padding would inflate the
        # 9x-expanded patch stream).
        tk, K_p = K, K
    else:
        tk = 512
        K_p = _round_up(K, tk)
    num_k = K_p // tk

    xp = patches.astype(jnp.bfloat16)
    if (M_p, K_p) != (M, K):
        xp = jnp.pad(xp, ((0, M_p - M), (0, K_p - K)))
    wp = jnp.pad(w, ((0, K_p - K), (0, Co_p - Co))).astype(jnp.bfloat16)

    y, stats = pl.pallas_call(
        matmul_stats_kernel,
        out_shape=(jax.ShapeDtypeStruct((M_p, Co_p), jnp.bfloat16),
                   jax.ShapeDtypeStruct((num_m * 8, Co_p), jnp.float32)),
        grid_spec=pltpu.PrefetchScalarGridSpec(
            num_scalar_prefetch=0,
            grid=(num_m, num_k),
            in_specs=[pl.BlockSpec((tm, tk), lambda i, k: (i, k)),
                      pl.BlockSpec((tk, Co_p), lambda i, k: (k, 0))],
            out_specs=[pl.BlockSpec((tm, Co_p), lambda i, k: (i, 0)),
                       pl.BlockSpec((8, Co_p), lambda i, k: (i, 0))],
            scratch_shapes=[pltpu.VMEM((tm, Co_p), jnp.float32)]),
        compiler_params=pltpu.CompilerParams(
            dimension_semantics=("parallel", "arbitrary"),
            vmem_limit_bytes=_VMEM_LIMIT),
    )(xp, wp)
    return y, stats, Co_p


def _fold_bn(stats, count, gamma, beta):
    """Tiny per-channel reduction + training-mode BN scale/shift fold (plain XLA).
    Padded rows contributed zero to the sums, so divide by the true count.
    NOTE: single-pass E[y^2]-E[y]^2 variance; fine here, swap to a two-pass /
    Welford form if reused on activations with mean >> std."""
    Co_p = stats.shape[1]
    s1 = jnp.sum(stats[0::8, :], axis=0)
    s2 = jnp.sum(stats[1::8, :], axis=0)
    mean = s1 / count
    var = jnp.maximum(s2 / count - mean * mean, 0.0)      # biased variance (PyTorch BN)
    gamma_p = jnp.pad(gamma, (0, Co_p - gamma.shape[0]))
    beta_p = jnp.pad(beta, (0, Co_p - beta.shape[0]))
    scale = gamma_p * jax.lax.rsqrt(var + EPS)
    shift = beta_p - mean * scale
    return scale.reshape(1, Co_p), shift.reshape(1, Co_p)


# ---------------------------------------------------------------------------
# pass 2: folded BN (+ BN-folded residual) (+ ReLU), lane-dense tiles
# ---------------------------------------------------------------------------
def bn_apply(y, scale, shift, *, tm, relu, out_dtype,
             residual=None, res_scale=None, res_shift=None):
    M_p, Co_p = y.shape
    num_m = M_p // tm

    in_specs = [pl.BlockSpec((tm, Co_p), lambda i: (i, 0)),
                pl.BlockSpec((1, Co_p), lambda i: (0, 0)),
                pl.BlockSpec((1, Co_p), lambda i: (0, 0))]
    args = [y, scale, shift]
    if residual is not None:
        in_specs += [pl.BlockSpec((tm, Co_p), lambda i: (i, 0)),
                     pl.BlockSpec((1, Co_p), lambda i: (0, 0)),
                     pl.BlockSpec((1, Co_p), lambda i: (0, 0))]
        args += [residual, res_scale, res_shift]
        kern = bn_apply_res_kernel
    else:
        kern = functools.partial(bn_apply_kernel, relu=relu)

    return pl.pallas_call(
        kern,
        out_shape=jax.ShapeDtypeStruct((M_p, Co_p), out_dtype),
        grid_spec=pltpu.PrefetchScalarGridSpec(
            num_scalar_prefetch=0,
            grid=(num_m,),
            in_specs=in_specs,
            out_specs=pl.BlockSpec((tm, Co_p), lambda i: (i, 0))),
        compiler_params=pltpu.CompilerParams(
            dimension_semantics=("parallel",),
            vmem_limit_bytes=_VMEM_LIMIT),
    )(*args)


# ---------------------------------------------------------------------------
# Glue: im2col / weight reshuffle (plain JAX layout plumbing)
# ---------------------------------------------------------------------------
def im2col(x_nhwc, kh, kw, stride, pad):
    x = jnp.pad(x_nhwc, ((0, 0), (pad, pad), (pad, pad), (0, 0)))
    N, H, W, C = x.shape
    Ho = (H - kh) // stride + 1
    Wo = (W - kw) // stride + 1
    cols = []
    for i in range(kh):
        for j in range(kw):
            cols.append(x[:, i:i + stride * Ho:stride, j:j + stride * Wo:stride, :])
    p = jnp.concatenate(cols, axis=-1)              # (N, Ho, Wo, kh*kw*C)
    return p.reshape(N * Ho * Wo, kh * kw * C), Ho, Wo


def reshape_conv_weight(w_oihw):
    # (Cout, Cin, kh, kw) -> (kh*kw*Cin, Cout), matching im2col ordering
    Co, Ci, kh, kw = w_oihw.shape
    return jnp.transpose(w_oihw, (2, 3, 1, 0)).reshape(kh * kw * Ci, Co)


# ---------------------------------------------------------------------------
# ResidualBlock forward
# ---------------------------------------------------------------------------
def residual_block_forward(x_nchw, params, downsample=False):
    stride = 2 if downsample else 1
    # bf16 once, up front: patches are built directly in bf16 (MXU input dtype).
    x = jnp.transpose(x_nchw, (0, 2, 3, 1)).astype(jnp.bfloat16)     # NHWC
    N, H, W, Cin = x.shape
    Cout = params["w1"].shape[0]

    # ---- conv1 -> bn1 -> relu (pass-2 output kept bf16: only feeds conv2) ----
    p1, Ho, Wo = im2col(x, 3, 3, stride, 1)
    M1 = p1.shape[0]
    tm1 = _choose_tm(M1)
    y1, st1, _ = matmul_stats(p1, reshape_conv_weight(params["w1"]), tm=tm1)
    sc1, sh1 = _fold_bn(st1, M1, params["g1"], params["be1"])
    out1 = bn_apply(y1, sc1, sh1, tm=tm1, relu=True, out_dtype=jnp.bfloat16)
    out_img = out1[:M1, :Cout].reshape(N, Ho, Wo, Cout)

    # ---- conv2 pass 1 ---------------------------------------------------------
    M2 = N * Ho * Wo
    tm2 = _choose_tm(M2)
    p2, _, _ = im2col(out_img, 3, 3, 1, 1)
    y2, st2, Co_p = matmul_stats(p2, reshape_conv_weight(params["w2"]), tm=tm2)
    sc2, sh2 = _fold_bn(st2, M2, params["g2"], params["be2"])
    M2_p = y2.shape[0]

    # ---- residual stream (shortcut BN fused into conv2's pass 2) --------------
    if downsample or Cin != Cout:
        xs = x[:, ::stride, ::stride, :][:, :Ho, :Wo, :].reshape(M2, Cin)
        ys, sts, _ = matmul_stats(xs, reshape_conv_weight(params["ws"]), tm=tm2)
        rsc, rsh = _fold_bn(sts, M2, params["gs"], params["bes"])
        res = ys                                       # raw bf16 (M2_p, Co_p)
    else:
        # identity shortcut (Cin == Cout): no BN -> unit scale / zero shift
        res = jnp.pad(x.reshape(M2, Cin), ((0, M2_p - M2), (0, Co_p - Cin)))
        rsc = jnp.ones((1, Co_p), jnp.float32)
        rsh = jnp.zeros((1, Co_p), jnp.float32)

    # ---- conv2 pass 2: bn2 + BN-folded residual + relu, single fused kernel ---
    out = bn_apply(y2, sc2, sh2, tm=tm2, relu=True, out_dtype=jnp.float32,
                   residual=res, res_scale=rsc, res_shift=rsh)
    y = out[:M2, :Cout].reshape(N, Ho, Wo, Cout)
    return jnp.transpose(y, (0, 3, 1, 2))              # back to NCHW, f32


# ---------------------------------------------------------------------------
# Pure-JAX reference (f32, includes conv bias) for sanity checking
# ---------------------------------------------------------------------------
def _bn_train(y, gamma, beta):
    mean = jnp.mean(y, axis=0, keepdims=True)
    var = jnp.mean((y - mean) ** 2, axis=0, keepdims=True)
    return (y - mean) * jax.lax.rsqrt(var + EPS) * gamma + beta


def _ref_conv_bn(p, w, cb, g, b, relu):
    y = p @ w + cb[None, :]
    y = _bn_train(y, g[None, :], b[None, :])
    return jnp.maximum(y, 0.0) if relu else y


def residual_block_ref(x_nchw, params, downsample):
    stride = 2 if downsample else 1
    x = jnp.transpose(x_nchw, (0, 2, 3, 1)).astype(jnp.float32)
    N, H, W, Cin = x.shape
    Cout = params["w1"].shape[0]
    p1, Ho, Wo = im2col(x, 3, 3, stride, 1)
    out = _ref_conv_bn(p1, reshape_conv_weight(params["w1"]), params["cb1"],
                       params["g1"], params["be1"], True)
    out_img = out.reshape(N, Ho, Wo, Cout)
    if downsample or Cin != Cout:
        xs = x[:, ::stride, ::stride, :][:, :Ho, :Wo, :].reshape(N * Ho * Wo, Cin)
        identity = _ref_conv_bn(xs, reshape_conv_weight(params["ws"]), params["cbs"],
                                params["gs"], params["bes"], False)
    else:
        identity = x.reshape(N * H * W, Cin)
    p2, _, _ = im2col(out_img, 3, 3, 1, 1)
    y = _ref_conv_bn(p2, reshape_conv_weight(params["w2"]), params["cb2"],
                     params["g2"], params["be2"], False)
    y = jnp.maximum(y + identity, 0.0).reshape(N, Ho, Wo, Cout)
    return jnp.transpose(y, (0, 3, 1, 2))


# ---------------------------------------------------------------------------
def init_params(key, in_channels, out_channels):
    ks = jax.random.split(key, 12)
    n = jax.random.normal
    return {
        "w1":  0.1 * n(ks[0], (out_channels, in_channels, 3, 3), jnp.float32),
        "cb1": 0.01 * n(ks[1], (out_channels,), jnp.float32),
        "g1":  1.0 + 0.1 * n(ks[2], (out_channels,), jnp.float32),
        "be1": 0.1 * n(ks[3], (out_channels,), jnp.float32),
        "w2":  0.1 * n(ks[4], (out_channels, out_channels, 3, 3), jnp.float32),
        "cb2": 0.01 * n(ks[5], (out_channels,), jnp.float32),
        "g2":  1.0 + 0.1 * n(ks[6], (out_channels,), jnp.float32),
        "be2": 0.1 * n(ks[7], (out_channels,), jnp.float32),
        "ws":  0.1 * n(ks[8], (out_channels, in_channels, 1, 1), jnp.float32),
        "cbs": 0.01 * n(ks[9], (out_channels,), jnp.float32),
        "gs":  1.0 + 0.1 * n(ks[10], (out_channels,), jnp.float32),
        "bes": 0.1 * n(ks[11], (out_channels,), jnp.float32),
    }


if __name__ == "__main__":
    key = jax.random.PRNGKey(0)
    k1, k2, k3, k4 = jax.random.split(key, 4)

    # Tolerance rationale: patches, weights, pass-1 outputs and the residual stream
    # are bf16 (MXU/traffic), while the reference is pure f32; BN's 1/std rescale
    # amplifies the bf16 rounding, so a ~5e-2 band is expected and acceptable.
    TOL = 5e-2

    # case 1: downsample block (projection shortcut), Cin != Cout
    x = jax.random.normal(k1, (2, 4, 16, 16), jnp.float32)       # NCHW
    params = init_params(k2, 4, 8)
    fwd = jax.jit(functools.partial(residual_block_forward, downsample=True))
    y = jax.block_until_ready(fwd(x, params))
    y_ref = jax.block_until_ready(residual_block_ref(x, params, True))
    assert y.shape == (2, 8, 8, 8), y.shape
    assert bool(jnp.all(jnp.isfinite(y)))
    np.testing.assert_allclose(np.asarray(y), np.asarray(y_ref), rtol=TOL, atol=TOL)

    # case 2: identity shortcut, Cin == Cout, stride 1
    x2 = jax.random.normal(k3, (2, 8, 16, 16), jnp.float32)
    params2 = init_params(k4, 8, 8)
    fwd2 = jax.jit(functools.partial(residual_block_forward, downsample=False))
    y2 = jax.block_until_ready(fwd2(x2, params2))
    y2_ref = jax.block_until_ready(residual_block_ref(x2, params2, False))
    assert y2.shape == (2, 8, 16, 16), y2.shape
    assert bool(jnp.all(jnp.isfinite(y2)))
    np.testing.assert_allclose(np.asarray(y2), np.asarray(y2_ref), rtol=TOL, atol=TOL)

    print("KERNEL_OK")
</pallas_src>

<mosaic_0001>
module attributes {stable_mosaic.version = 11 : i64} {
  func.func @matmul_stats_kernel(%arg0: i32, %arg1: i32, %arg2: memref<64x36xbf16, #tpu.memory_space<vmem>>, %arg3: memref<36x128xbf16, #tpu.memory_space<vmem>>, %arg4: memref<64x128xbf16, #tpu.memory_space<vmem>>, %arg5: memref<8x128xf32, #tpu.memory_space<vmem>>, %arg6: memref<64x128xf32, #tpu.memory_space<vmem>>) attributes {dimension_semantics = [#tpu.dimension_semantics<parallel>, #tpu.dimension_semantics<arbitrary>], iteration_bounds = array<i64: 2, 1>, scalar_prefetch = 0 : i64, scratch_operands = 1 : i64, tpu.core_type = #tpu.core_type<tc>, window_params = [{transform_indices = @transform_0, window_bounds = array<i64: 64, 36>}, {transform_indices = @transform_1, window_bounds = array<i64: 36, 128>}, {transform_indices = @transform_2, window_bounds = array<i64: 64, 128>}, {transform_indices = @transform_3, window_bounds = array<i64: 8, 128>}]} {
    %c0_i32 = arith.constant 0 : i32
    %0 = arith.cmpi eq, %arg1, %c0_i32 : i32
    %1 = arith.extui %0 : i1 to i32
    %c0_i32_0 = arith.constant 0 : i32
    %2 = arith.cmpi ne, %1, %c0_i32_0 : i32
    scf.if %2 {
      %cst_10 = arith.constant 0.000000e+00 : f32
      %12 = vector.broadcast %cst_10 : f32 to vector<64x128xf32>
      %c0_11 = arith.constant 0 : index
      %c0_12 = arith.constant 0 : index
      %13 = vector.load %arg6[%c0_11, %c0_12] : memref<64x128xf32, #tpu.memory_space<vmem>>, vector<64x128xf32>
      tpu.vector_store %arg6[%c0_11, %c0_12], %12 {strides = array<i32>} : memref<64x128xf32, #tpu.memory_space<vmem>>, vector<64x128xf32>,
    } else {
    }
    %c0 = arith.constant 0 : index
    %c0_1 = arith.constant 0 : index
    %3 = vector.load %arg6[%c0, %c0_1] : memref<64x128xf32, #tpu.memory_space<vmem>>, vector<64x128xf32>
    %c0_2 = arith.constant 0 : index
    %c0_3 = arith.constant 0 : index
    %4 = vector.load %arg2[%c0_2, %c0_3] : memref<64x36xbf16, #tpu.memory_space<vmem>>, vector<64x36xbf16>
    %c0_4 = arith.constant 0 : index
    %c0_5 = arith.constant 0 : index
    %5 = vector.load %arg3[%c0_4, %c0_5] : memref<36x128xbf16, #tpu.memory_space<vmem>>, vector<36x128xbf16>
    %cst = arith.constant dense<0.000000e+00> : vector<64x128xf32>
    %6 = tpu.matmul %4, %5, %cst {dimension_numbers = #tpu.dot_dimension_numbers<[1], [0], [0], [1], [0, 0, 1, 1], [], []>} : vector<64x36xbf16>, vector<36x128xbf16>, vector<64x128xf32> -> vector<64x128xf32>
    %7 = arith.addf %3, %6 : vector<64x128xf32>
    %c0_6 = arith.constant 0 : index
    %c0_7 = arith.constant 0 : index
    %8 = vector.load %arg6[%c0_6, %c0_7] : memref<64x128xf32, #tpu.memory_space<vmem>>, vector<64x128xf32>
    tpu.vector_store %arg6[%c0_6, %c0_7], %7 {strides = array<i32>} : memref<64x128xf32, #tpu.memory_space<vmem>>, vector<64x128xf32>,
    %c0_i32_8 = arith.constant 0 : i32
    %9 = arith.cmpi eq, %arg1, %c0_i32_8 : i32
    %10 = arith.extui %9 : i1 to i32
    %c0_i32_9 = arith.constant 0 : i32
    %11 = arith.cmpi ne, %10, %c0_i32_9 : i32
    scf.if %11 {
      %c0_10 = arith.constant 0 : index
      %c0_11 = arith.constant 0 : index
      %12 = vector.load %arg6[%c0_10, %c0_11] : memref<64x128xf32, #tpu.memory_space<vmem>>, vector<64x128xf32>
      %13 = arith.truncf %12 : vector<64x128xf32> to vector<64x128xbf16>
      %c0_12 = arith.constant 0 : index
      %c0_13 = arith.constant 0 : index
      %14 = vector.load %arg4[%c0_12, %c0_13] : memref<64x128xbf16, #tpu.memory_space<vmem>>, vector<64x128xbf16>
      tpu.vector_store %arg4[%c0_12, %c0_13], %13 {strides = array<i32>} : memref<64x128xbf16, #tpu.memory_space<vmem>>, vector<64x128xbf16>,
      %cst_14 = arith.constant dense<0.000000e+00> : vector<128xf32>
      %15 = vector.multi_reduction <add>, %12, %cst_14 [0] : vector<64x128xf32> to vector<128xf32>
      %16 = vector.shape_cast %15 : vector<128xf32> to vector<1x128xf32>
      %17 = arith.mulf %12, %12 : vector<64x128xf32>
      %cst_15 = arith.constant dense<0.000000e+00> : vector<128xf32>
      %18 = vector.multi_reduction <add>, %17, %cst_15 [0] : vector<64x128xf32> to vector<128xf32>
      %19 = vector.shape_cast %18 : vector<128xf32> to vector<1x128xf32>
      %20 = tpu.iota {dimensions = array<i32: 0>} : vector<8x128xi32>
      %c0_i32_16 = arith.constant 0 : i32
      %21 = vector.broadcast %c0_i32_16 : i32 to vector<8x128xi32>
      %22 = arith.cmpi eq, %20, %21 : vector<8x128xi32>
      %c1_i32 = arith.constant 1 : i32
      %23 = vector.broadcast %c1_i32 : i32 to vector<8x128xi32>
      %24 = arith.cmpi eq, %20, %23 : vector<8x128xi32>
      %cst_17 = arith.constant 0.000000e+00 : f32
      %25 = vector.shape_cast %19 : vector<1x128xf32> to vector<1x128xf32>
      %26 = vector.broadcast %25 : vector<1x128xf32> to vector<8x128xf32>
      %27 = vector.broadcast %cst_17 : f32 to vector<8x128xf32>
      %28 = arith.select %24, %26, %27 : vector<8x128xi1>, vector<8x128xf32>
      %29 = vector.shape_cast %16 : vector<1x128xf32> to vector<1x128xf32>
      %30 = vector.broadcast %29 : vector<1x128xf32> to vector<8x128xf32>
      %31 = arith.select %22, %30, %28 : vector<8x128xi1>, vector<8x128xf32>
      %c0_18 = arith.constant 0 : index
      %c0_19 = arith.constant 0 : index
      %32 = vector.load %arg5[%c0_18, %c0_19] : memref<8x128xf32, #tpu.memory_space<vmem>>, vector<8x128xf32>
      tpu.vector_store %arg5[%c0_18, %c0_19], %31 {strides = array<i32>} : memref<8x128xf32, #tpu.memory_space<vmem>>, vector<8x128xf32>,
    } else {
    }
    return
  }
  func.func @transform_0(%arg0: i32, %arg1: i32) -> (i32, i32) {
    %c0_i32 = arith.constant 0 : i32
    return %arg0, %arg1 : i32, i32
  }
  func.func @transform_1(%arg0: i32, %arg1: i32) -> (i32, i32) {
    %c0_i32 = arith.constant 0 : i32
    %c0_i32_0 = arith.constant 0 : i32
    return %arg1, %c0_i32 : i32, i32
  }
  func.func @transform_2(%arg0: i32, %arg1: i32) -> (i32, i32) {
    %c0_i32 = arith.constant 0 : i32
    %c0_i32_0 = arith.constant 0 : i32
    return %arg0, %c0_i32 : i32, i32
  }
  func.func @transform_3(%arg0: i32, %arg1: i32) -> (i32, i32) {
    %c0_i32 = arith.constant 0 : i32
    %c0_i32_0 = arith.constant 0 : i32
    return %arg0, %c0_i32 : i32, i32
  }
}

module attributes {stable_mosaic.version = 11 : i64} {
  func.func @bn_apply_kernel(%arg0: i32, %arg1: memref<64x128xbf16, #tpu.memory_space<vmem>>, %arg2: memref<1x128xf32, #tpu.memory_space<vmem>>, %arg3: memref<1x128xf32, #tpu.memory_space<vmem>>, %arg4: memref<64x128xbf16, #tpu.memory_space<vmem>>) attributes {dimension_semantics = [#tpu.dimension_semantics<parallel>], iteration_bounds = array<i64: 2>, scalar_prefetch = 0 : i64, scratch_operands = 0 : i64, tpu.core_type = #tpu.core_type<tc>, window_params = [{transform_indices = @transform_0, window_bounds = array<i64: 64, 128>}, {pipeline_mode = #tpu.pipeline_mode<synchronous>, transform_indices = @transform_1, window_bounds = array<i64: 1, 128>}, {pipeline_mode = #tpu.pipeline_mode<synchronous>, transform_indices = @transform_2, window_bounds = array<i64: 1, 128>}, {transform_indices = @transform_3, window_bounds = array<i64: 64, 128>}]} {
    %c0 = arith.constant 0 : index
    %c0_0 = arith.constant 0 : index
    %0 = vector.load %arg1[%c0, %c0_0] : memref<64x128xbf16, #tpu.memory_space<vmem>>, vector<64x128xbf16>
    %1 = arith.extf %0 : vector<64x128xbf16> to vector<64x128xf32>
    %c0_1 = arith.constant 0 : index
    %c0_2 = arith.constant 0 : index
    %2 = vector.load %arg2[%c0_1, %c0_2] : memref<1x128xf32, #tpu.memory_space<vmem>>, vector<1x128xf32>
    %3 = vector.broadcast %2 : vector<1x128xf32> to vector<64x128xf32>
    %4 = arith.mulf %1, %3 : vector<64x128xf32>
    %c0_3 = arith.constant 0 : index
    %c0_4 = arith.constant 0 : index
    %5 = vector.load %arg3[%c0_3, %c0_4] : memref<1x128xf32, #tpu.memory_space<vmem>>, vector<1x128xf32>
    %6 = vector.broadcast %5 : vector<1x128xf32> to vector<64x128xf32>
    %7 = arith.addf %4, %6 : vector<64x128xf32>
    %cst = arith.constant 0.000000e+00 : f32
    %8 = vector.broadcast %cst : f32 to vector<64x128xf32>
    %9 = arith.maximumf %7, %8 : vector<64x128xf32>
    %10 = arith.truncf %9 : vector<64x128xf32> to vector<64x128xbf16>
    %c0_5 = arith.constant 0 : index
    %c0_6 = arith.constant 0 : index
    %11 = vector.load %arg4[%c0_5, %c0_6] : memref<64x128xbf16, #tpu.memory_space<vmem>>, vector<64x128xbf16>
    tpu.vector_store %arg4[%c0_5, %c0_6], %10 {strides = array<i32>} : memref<64x128xbf16, #tpu.memory_space<vmem>>, vector<64x128xbf16>,
    return
  }
  func.func @transform_0(%arg0: i32) -> (i32, i32) {
    %c0_i32 = arith.constant 0 : i32
    %c0_i32_0 = arith.constant 0 : i32
    return %arg0, %c0_i32 : i32, i32
  }
  func.func @transform_1(%arg0: i32) -> (i32, i32) {
    %c0_i32 = arith.constant 0 : i32
    %c0_i32_0 = arith.constant 0 : i32
    %c0_i32_1 = arith.constant 0 : i32
    return %c0_i32, %c0_i32_0 : i32, i32
  }
  func.func @transform_2(%arg0: i32) -> (i32, i32) {
    %c0_i32 = arith.constant 0 : i32
    %c0_i32_0 = arith.constant 0 : i32
    %c0_i32_1 = arith.constant 0 : i32
    return %c0_i32, %c0_i32_0 : i32, i32
  }
  func.func @transform_3(%arg0: i32) -> (i32, i32) {
    %c0_i32 = arith.constant 0 : i32
    %c0_i32_0 = arith.constant 0 : i32
    return %arg0, %c0_i32 : i32, i32
  }
}

module attributes {stable_mosaic.version = 11 : i64} {
  func.func @matmul_stats_kernel(%arg0: i32, %arg1: i32, %arg2: memref<64x72xbf16, #tpu.memory_space<vmem>>, %arg3: memref<72x128xbf16, #tpu.memory_space<vmem>>, %arg4: memref<64x128xbf16, #tpu.memory_space<vmem>>, %arg5: memref<8x128xf32, #tpu.memory_space<vmem>>, %arg6: memref<64x128xf32, #tpu.memory_space<vmem>>) attributes {dimension_semantics = [#tpu.dimension_semantics<parallel>, #tpu.dimension_semantics<arbitrary>], iteration_bounds = array<i64: 2, 1>, scalar_prefetch = 0 : i64, scratch_operands = 1 : i64, tpu.core_type = #tpu.core_type<tc>, window_params = [{transform_indices = @transform_0, window_bounds = array<i64: 64, 72>}, {transform_indices = @transform_1, window_bounds = array<i64: 72, 128>}, {transform_indices = @transform_2, window_bounds = array<i64: 64, 128>}, {transform_indices = @transform_3, window_bounds = array<i64: 8, 128>}]} {
    %c0_i32 = arith.constant 0 : i32
    %0 = arith.cmpi eq, %arg1, %c0_i32 : i32
    %1 = arith.extui %0 : i1 to i32
    %c0_i32_0 = arith.constant 0 : i32
    %2 = arith.cmpi ne, %1, %c0_i32_0 : i32
    scf.if %2 {
      %cst_10 = arith.constant 0.000000e+00 : f32
      %12 = vector.broadcast %cst_10 : f32 to vector<64x128xf32>
      %c0_11 = arith.constant 0 : index
      %c0_12 = arith.constant 0 : index
      %13 = vector.load %arg6[%c0_11, %c0_12] : memref<64x128xf32, #tpu.memory_space<vmem>>, vector<64x128xf32>
      tpu.vector_store %arg6[%c0_11, %c0_12], %12 {strides = array<i32>} : memref<64x128xf32, #tpu.memory_space<vmem>>, vector<64x128xf32>,
    } else {
    }
    %c0 = arith.constant 0 : index
    %c0_1 = arith.constant 0 : index
    %3 = vector.load %arg6[%c0, %c0_1] : memref<64x128xf32, #tpu.memory_space<vmem>>, vector<64x128xf32>
    %c0_2 = arith.constant 0 : index
    %c0_3 = arith.constant 0 : index
    %4 = vector.load %arg2[%c0_2, %c0_3] : memref<64x72xbf16, #tpu.memory_space<vmem>>, vector<64x72xbf16>
    %c0_4 = arith.constant 0 : index
    %c0_5 = arith.constant 0 : index
    %5 = vector.load %arg3[%c0_4, %c0_5] : memref<72x128xbf16, #tpu.memory_space<vmem>>, vector<72x128xbf16>
    %cst = arith.constant dense<0.000000e+00> : vector<64x128xf32>
    %6 = tpu.matmul %4, %5, %cst {dimension_numbers = #tpu.dot_dimension_numbers<[1], [0], [0], [1], [0, 0, 1, 1], [], []>} : vector<64x72xbf16>, vector<72x128xbf16>, vector<64x128xf32> -> vector<64x128xf32>
    %7 = arith.addf %3, %6 : vector<64x128xf32>
    %c0_6 = arith.constant 0 : index
    %c0_7 = arith.constant 0 : index
    %8 = vector.load %arg6[%c0_6, %c0_7] : memref<64x128xf32, #tpu.memory_space<vmem>>, vector<64x128xf32>
    tpu.vector_store %arg6[%c0_6, %c0_7], %7 {strides = array<i32>} : memref<64x128xf32, #tpu.memory_space<vmem>>, vector<64x128xf32>,
    %c0_i32_8 = arith.constant 0 : i32
    %9 = arith.cmpi eq, %arg1, %c0_i32_8 : i32
    %10 = arith.extui %9 : i1 to i32
    %c0_i32_9 = arith.constant 0 : i32
    %11 = arith.cmpi ne, %10, %c0_i32_9 : i32
    scf.if %11 {
      %c0_10 = arith.constant 0 : index
      %c0_11 = arith.constant 0 : index
      %12 = vector.load %arg6[%c0_10, %c0_11] : memref<64x128xf32, #tpu.memory_space<vmem>>, vector<64x128xf32>
      %13 = arith.truncf %12 : vector<64x128xf32> to vector<64x128xbf16>
      %c0_12 = arith.constant 0 : index
      %c0_13 = arith.constant 0 : index
      %14 = vector.load %arg4[%c0_12, %c0_13] : memref<64x128xbf16, #tpu.memory_space<vmem>>, vector<64x128xbf16>
      tpu.vector_store %arg4[%c0_12, %c0_13], %13 {strides = array<i32>} : memref<64x128xbf16, #tpu.memory_space<vmem>>, vector<64x128xbf16>,
      %cst_14 = arith.constant dense<0.000000e+00> : vector<128xf32>
      %15 = vector.multi_reduction <add>, %12, %cst_14 [0] : vector<64x128xf32> to vector<128xf32>
      %16 = vector.shape_cast %15 : vector<128xf32> to vector<1x128xf32>
      %17 = arith.mulf %12, %12 : vector<64x128xf32>
      %cst_15 = arith.constant dense<0.000000e+00> : vector<128xf32>
      %18 = vector.multi_reduction <add>, %17, %cst_15 [0] : vector<64x128xf32> to vector<128xf32>
      %19 = vector.shape_cast %18 : vector<128xf32> to vector<1x128xf32>
      %20 = tpu.iota {dimensions = array<i32: 0>} : vector<8x128xi32>
      %c0_i32_16 = arith.constant 0 : i32
      %21 = vector.broadcast %c0_i32_16 : i32 to vector<8x128xi32>
      %22 = arith.cmpi eq, %20, %21 : vector<8x128xi32>
      %c1_i32 = arith.constant 1 : i32
      %23 = vector.broadcast %c1_i32 : i32 to vector<8x128xi32>
      %24 = arith.cmpi eq, %20, %23 : vector<8x128xi32>
      %cst_17 = arith.constant 0.000000e+00 : f32
      %25 = vector.shape_cast %19 : vector<1x128xf32> to vector<1x128xf32>
      %26 = vector.broadcast %25 : vector<1x128xf32> to vector<8x128xf32>
      %27 = vector.broadcast %cst_17 : f32 to vector<8x128xf32>
      %28 = arith.select %24, %26, %27 : vector<8x128xi1>, vector<8x128xf32>
      %29 = vector.shape_cast %16 : vector<1x128xf32> to vector<1x128xf32>
      %30 = vector.broadcast %29 : vector<1x128xf32> to vector<8x128xf32>
      %31 = arith.select %22, %30, %28 : vector<8x128xi1>, vector<8x128xf32>
      %c0_18 = arith.constant 0 : index
      %c0_19 = arith.constant 0 : index
      %32 = vector.load %arg5[%c0_18, %c0_19] : memref<8x128xf32, #tpu.memory_space<vmem>>, vector<8x128xf32>
      tpu.vector_store %arg5[%c0_18, %c0_19], %31 {strides = array<i32>} : memref<8x128xf32, #tpu.memory_space<vmem>>, vector<8x128xf32>,
    } else {
    }
    return
  }
  func.func @transform_0(%arg0: i32, %arg1: i32) -> (i32, i32) {
    %c0_i32 = arith.constant 0 : i32
    return %arg0, %arg1 : i32, i32
  }
  func.func @transform_1(%arg0: i32, %arg1: i32) -> (i32, i32) {
    %c0_i32 = arith.constant 0 : i32
    %c0_i32_0 = arith.constant 0 : i32
    return %arg1, %c0_i32 : i32, i32
  }
  func.func @transform_2(%arg0: i32, %arg1: i32) -> (i32, i32) {
    %c0_i32 = arith.constant 0 : i32
    %c0_i32_0 = arith.constant 0 : i32
    return %arg0, %c0_i32 : i32, i32
  }
  func.func @transform_3(%arg0: i32, %arg1: i32) -> (i32, i32) {
    %c0_i32 = arith.constant 0 : i32
    %c0_i32_0 = arith.constant 0 : i32
    return %arg0, %c0_i32 : i32, i32
  }
}

module attributes {stable_mosaic.version = 11 : i64} {
  func.func @matmul_stats_kernel(%arg0: i32, %arg1: i32, %arg2: memref<64x4xbf16, #tpu.memory_space<vmem>>, %arg3: memref<4x128xbf16, #tpu.memory_space<vmem>>, %arg4: memref<64x128xbf16, #tpu.memory_space<vmem>>, %arg5: memref<8x128xf32, #tpu.memory_space<vmem>>, %arg6: memref<64x128xf32, #tpu.memory_space<vmem>>) attributes {dimension_semantics = [#tpu.dimension_semantics<parallel>, #tpu.dimension_semantics<arbitrary>], iteration_bounds = array<i64: 2, 1>, scalar_prefetch = 0 : i64, scratch_operands = 1 : i64, tpu.core_type = #tpu.core_type<tc>, window_params = [{transform_indices = @transform_0, window_bounds = array<i64: 64, 4>}, {transform_indices = @transform_1, window_bounds = array<i64: 4, 128>}, {transform_indices = @transform_2, window_bounds = array<i64: 64, 128>}, {transform_indices = @transform_3, window_bounds = array<i64: 8, 128>}]} {
    %c0_i32 = arith.constant 0 : i32
    %0 = arith.cmpi eq, %arg1, %c0_i32 : i32
    %1 = arith.extui %0 : i1 to i32
    %c0_i32_0 = arith.constant 0 : i32
    %2 = arith.cmpi ne, %1, %c0_i32_0 : i32
    scf.if %2 {
      %cst_10 = arith.constant 0.000000e+00 : f32
      %12 = vector.broadcast %cst_10 : f32 to vector<64x128xf32>
      %c0_11 = arith.constant 0 : index
      %c0_12 = arith.constant 0 : index
      %13 = vector.load %arg6[%c0_11, %c0_12] : memref<64x128xf32, #tpu.memory_space<vmem>>, vector<64x128xf32>
      tpu.vector_store %arg6[%c0_11, %c0_12], %12 {strides = array<i32>} : memref<64x128xf32, #tpu.memory_space<vmem>>, vector<64x128xf32>,
    } else {
    }
    %c0 = arith.constant 0 : index
    %c0_1 = arith.constant 0 : index
    %3 = vector.load %arg6[%c0, %c0_1] : memref<64x128xf32, #tpu.memory_space<vmem>>, vector<64x128xf32>
    %c0_2 = arith.constant 0 : index
    %c0_3 = arith.constant 0 : index
    %4 = vector.load %arg2[%c0_2, %c0_3] : memref<64x4xbf16, #tpu.memory_space<vmem>>, vector<64x4xbf16>
    %c0_4 = arith.constant 0 : index
    %c0_5 = arith.constant 0 : index
    %5 = vector.load %arg3[%c0_4, %c0_5] : memref<4x128xbf16, #tpu.memory_space<vmem>>, vector<4x128xbf16>
    %cst = arith.constant dense<0.000000e+00> : vector<64x128xf32>
    %6 = tpu.matmul %4, %5, %cst {dimension_numbers = #tpu.dot_dimension_numbers<[1], [0], [0], [1], [0, 0, 1, 1], [], []>} : vector<64x4xbf16>, vector<4x128xbf16>, vector<64x128xf32> -> vector<64x128xf32>
    %7 = arith.addf %3, %6 : vector<64x128xf32>
    %c0_6 = arith.constant 0 : index
    %c0_7 = arith.constant 0 : index
    %8 = vector.load %arg6[%c0_6, %c0_7] : memref<64x128xf32, #tpu.memory_space<vmem>>, vector<64x128xf32>
    tpu.vector_store %arg6[%c0_6, %c0_7], %7 {strides = array<i32>} : memref<64x128xf32, #tpu.memory_space<vmem>>, vector<64x128xf32>,
    %c0_i32_8 = arith.constant 0 : i32
    %9 = arith.cmpi eq, %arg1, %c0_i32_8 : i32
    %10 = arith.extui %9 : i1 to i32
    %c0_i32_9 = arith.constant 0 : i32
    %11 = arith.cmpi ne, %10, %c0_i32_9 : i32
    scf.if %11 {
      %c0_10 = arith.constant 0 : index
      %c0_11 = arith.constant 0 : index
      %12 = vector.load %arg6[%c0_10, %c0_11] : memref<64x128xf32, #tpu.memory_space<vmem>>, vector<64x128xf32>
      %13 = arith.truncf %12 : vector<64x128xf32> to vector<64x128xbf16>
      %c0_12 = arith.constant 0 : index
      %c0_13 = arith.constant 0 : index
      %14 = vector.load %arg4[%c0_12, %c0_13] : memref<64x128xbf16, #tpu.memory_space<vmem>>, vector<64x128xbf16>
      tpu.vector_store %arg4[%c0_12, %c0_13], %13 {strides = array<i32>} : memref<64x128xbf16, #tpu.memory_space<vmem>>, vector<64x128xbf16>,
      %cst_14 = arith.constant dense<0.000000e+00> : vector<128xf32>
      %15 = vector.multi_reduction <add>, %12, %cst_14 [0] : vector<64x128xf32> to vector<128xf32>
      %16 = vector.shape_cast %15 : vector<128xf32> to vector<1x128xf32>
      %17 = arith.mulf %12, %12 : vector<64x128xf32>
      %cst_15 = arith.constant dense<0.000000e+00> : vector<128xf32>
      %18 = vector.multi_reduction <add>, %17, %cst_15 [0] : vector<64x128xf32> to vector<128xf32>
      %19 = vector.shape_cast %18 : vector<128xf32> to vector<1x128xf32>
      %20 = tpu.iota {dimensions = array<i32: 0>} : vector<8x128xi32>
      %c0_i32_16 = arith.constant 0 : i32
      %21 = vector.broadcast %c0_i32_16 : i32 to vector<8x128xi32>
      %22 = arith.cmpi eq, %20, %21 : vector<8x128xi32>
      %c1_i32 = arith.constant 1 : i32
      %23 = vector.broadcast %c1_i32 : i32 to vector<8x128xi32>
      %24 = arith.cmpi eq, %20, %23 : vector<8x128xi32>
      %cst_17 = arith.constant 0.000000e+00 : f32
      %25 = vector.shape_cast %19 : vector<1x128xf32> to vector<1x128xf32>
      %26 = vector.broadcast %25 : vector<1x128xf32> to vector<8x128xf32>
      %27 = vector.broadcast %cst_17 : f32 to vector<8x128xf32>
      %28 = arith.select %24, %26, %27 : vector<8x128xi1>, vector<8x128xf32>
      %29 = vector.shape_cast %16 : vector<1x128xf32> to vector<1x128xf32>
      %30 = vector.broadcast %29 : vector<1x128xf32> to vector<8x128xf32>
      %31 = arith.select %22, %30, %28 : vector<8x128xi1>, vector<8x128xf32>
      %c0_18 = arith.constant 0 : index
      %c0_19 = arith.constant 0 : index
      %32 = vector.load %arg5[%c0_18, %c0_19] : memref<8x128xf32, #tpu.memory_space<vmem>>, vector<8x128xf32>
      tpu.vector_store %arg5[%c0_18, %c0_19], %31 {strides = array<i32>} : memref<8x128xf32, #tpu.memory_space<vmem>>, vector<8x128xf32>,
    } else {
    }
    return
  }
  func.func @transform_0(%arg0: i32, %arg1: i32) -> (i32, i32) {
    %c0_i32 = arith.constant 0 : i32
    return %arg0, %arg1 : i32, i32
  }
  func.func @transform_1(%arg0: i32, %arg1: i32) -> (i32, i32) {
    %c0_i32 = arith.constant 0 : i32
    %c0_i32_0 = arith.constant 0 : i32
    return %arg1, %c0_i32 : i32, i32
  }
  func.func @transform_2(%arg0: i32, %arg1: i32) -> (i32, i32) {
    %c0_i32 = arith.constant 0 : i32
    %c0_i32_0 = arith.constant 0 : i32
    return %arg0, %c0_i32 : i32, i32
  }
  func.func @transform_3(%arg0: i32, %arg1: i32) -> (i32, i32) {
    %c0_i32 = arith.constant 0 : i32
    %c0_i32_0 = arith.constant 0 : i32
    return %arg0, %c0_i32 : i32, i32
  }
}

module attributes {stable_mosaic.version = 11 : i64} {
  func.func @bn_apply_res_kernel(%arg0: i32, %arg1: memref<64x128xbf16, #tpu.memory_space<vmem>>, %arg2: memref<1x128xf32, #tpu.memory_space<vmem>>, %arg3: memref<1x128xf32, #tpu.memory_space<vmem>>, %arg4: memref<64x128xbf16, #tpu.memory_space<vmem>>, %arg5: memref<1x128xf32, #tpu.memory_space<vmem>>, %arg6: memref<1x128xf32, #tpu.memory_space<vmem>>, %arg7: memref<64x128xf32, #tpu.memory_space<vmem>>) attributes {dimension_semantics = [#tpu.dimension_semantics<parallel>], iteration_bounds = array<i64: 2>, scalar_prefetch = 0 : i64, scratch_operands = 0 : i64, tpu.core_type = #tpu.core_type<tc>, window_params = [{transform_indices = @transform_0, window_bounds = array<i64: 64, 128>}, {pipeline_mode = #tpu.pipeline_mode<synchronous>, transform_indices = @transform_1, window_bounds = array<i64: 1, 128>}, {pipeline_mode = #tpu.pipeline_mode<synchronous>, transform_indices = @transform_2, window_bounds = array<i64: 1, 128>}, {transform_indices = @transform_3, window_bounds = array<i64: 64, 128>}, {pipeline_mode = #tpu.pipeline_mode<synchronous>, transform_indices = @transform_4, window_bounds = array<i64: 1, 128>}, {pipeline_mode = #tpu.pipeline_mode<synchronous>, transform_indices = @transform_5, window_bounds = array<i64: 1, 128>}, {transform_indices = @transform_6, window_bounds = array<i64: 64, 128>}]} {
    %c0 = arith.constant 0 : index
    %c0_0 = arith.constant 0 : index
    %0 = vector.load %arg1[%c0, %c0_0] : memref<64x128xbf16, #tpu.memory_space<vmem>>, vector<64x128xbf16>
    %1 = arith.extf %0 : vector<64x128xbf16> to vector<64x128xf32>
    %c0_1 = arith.constant 0 : index
    %c0_2 = arith.constant 0 : index
    %2 = vector.load %arg2[%c0_1, %c0_2] : memref<1x128xf32, #tpu.memory_space<vmem>>, vector<1x128xf32>
    %3 = vector.broadcast %2 : vector<1x128xf32> to vector<64x128xf32>
    %4 = arith.mulf %1, %3 : vector<64x128xf32>
    %c0_3 = arith.constant 0 : index
    %c0_4 = arith.constant 0 : index
    %5 = vector.load %arg3[%c0_3, %c0_4] : memref<1x128xf32, #tpu.memory_space<vmem>>, vector<1x128xf32>
    %6 = vector.broadcast %5 : vector<1x128xf32> to vector<64x128xf32>
    %7 = arith.addf %4, %6 : vector<64x128xf32>
    %c0_5 = arith.constant 0 : index
    %c0_6 = arith.constant 0 : index
    %8 = vector.load %arg4[%c0_5, %c0_6] : memref<64x128xbf16, #tpu.memory_space<vmem>>, vector<64x128xbf16>
    %9 = arith.extf %8 : vector<64x128xbf16> to vector<64x128xf32>
    %c0_7 = arith.constant 0 : index
    %c0_8 = arith.constant 0 : index
    %10 = vector.load %arg5[%c0_7, %c0_8] : memref<1x128xf32, #tpu.memory_space<vmem>>, vector<1x128xf32>
    %11 = vector.broadcast %10 : vector<1x128xf32> to vector<64x128xf32>
    %12 = arith.mulf %9, %11 : vector<64x128xf32>
    %13 = arith.addf %7, %12 : vector<64x128xf32>
    %c0_9 = arith.constant 0 : index
    %c0_10 = arith.constant 0 : index
    %14 = vector.load %arg6[%c0_9, %c0_10] : memref<1x128xf32, #tpu.memory_space<vmem>>, vector<1x128xf32>
    %15 = vector.broadcast %14 : vector<1x128xf32> to vector<64x128xf32>
    %16 = arith.addf %13, %15 : vector<64x128xf32>
    %cst = arith.constant 0.000000e+00 : f32
    %17 = vector.broadcast %cst : f32 to vector<64x128xf32>
    %18 = arith.maximumf %16, %17 : vector<64x128xf32>
    %c0_11 = arith.constant 0 : index
    %c0_12 = arith.constant 0 : index
    %19 = vector.load %arg7[%c0_11, %c0_12] : memref<64x128xf32, #tpu.memory_space<vmem>>, vector<64x128xf32>
    tpu.vector_store %arg7[%c0_11, %c0_12], %18 {strides = array<i32>} : memref<64x128xf32, #tpu.memory_space<vmem>>, vector<64x128xf32>,
    return
  }
  func.func @transform_0(%arg0: i32) -> (i32, i32) {
    %c0_i32 = arith.constant 0 : i32
    %c0_i32_0 = arith.constant 0 : i32
    return %arg0, %c0_i32 : i32, i32
  }
  func.func @transform_1(%arg0: i32) -> (i32, i32) {
    %c0_i32 = arith.constant 0 : i32
    %c0_i32_0 = arith.constant 0 : i32
    %c0_i32_1 = arith.constant 0 : i32
    return %c0_i32, %c0_i32_0 : i32, i32
  }
  func.func @transform_2(%arg0: i32) -> (i32, i32) {
    %c0_i32 = arith.constant 0 : i32
    %c0_i32_0 = arith.constant 0 : i32
    %c0_i32_1 = arith.constant 0 : i32
    return %c0_i32, %c0_i32_0 : i32, i32
  }
  func.func @transform_3(%arg0: i32) -> (i32, i32) {
    %c0_i32 = arith.constant 0 : i32
    %c0_i32_0 = arith.constant 0 : i32
    return %arg0, %c0_i32 : i32, i32
  }
  func.func @transform_4(%arg0: i32) -> (i32, i32) {
    %c0_i32 = arith.constant 0 : i32
    %c0_i32_0 = arith.constant 0 : i32
    %c0_i32_1 = arith.constant 0 : i32
    return %c0_i32, %c0_i32_0 : i32, i32
  }
  func.func @transform_5(%arg0: i32) -> (i32, i32) {
    %c0_i32 = arith.constant 0 : i32
    %c0_i32_0 = arith.constant 0 : i32
    %c0_i32_1 = arith.constant 0 : i32
    return %c0_i32, %c0_i32_0 : i32, i32
  }
  func.func @transform_6(%arg0: i32) -> (i32, i32) {
    %c0_i32 = arith.constant 0 : i32
    %c0_i32_0 = arith.constant 0 : i32
    return %arg0, %c0_i32 : i32, i32
  }
}

</mosaic_0001>

<bundles_post_ra>
// kernel: residual_block_forward.5
= control target key start
LH: loop header
LB: loop body
LE: loop exit
PB: predicated region body
PF: predicated region fallthrough
CT: control target
= control target key end

     0   :  { %s690_s12 = smov 0   ;;  %s692_s13 = smov 0   ;;  %s743_s0 = inlined_call_operand.vmem [shape: bf16[128,36], index: 0, kind: input, shape index: {}]   ;;  %s744_s1 = inlined_call_operand.vmem [shape: bf16[36,128], index: 1, kind: input, shape index: {}]   ;;  %s745_s2 = inlined_call_operand.vmem [shape: bf16[128,128], index: 2, kind: output, shape index: {0}]   ;;  %s746_s3 = inlined_call_operand.vmem [shape: f32[16,128], index: 3, kind: output, shape index: {1}]  }
   0x1   :  { %s694_s14 = smov 0  }
   0x2 LB: > { %s26_s15 = sadd.s32 1, %s664_s13  ;;  %p548_p0 = scmp.ge.s32.totalorder %s668_s14, 1  ;;  %s668_s14 = sphi %s694_s14, %s14_s14   ;;  %s664_s13 = sphi %s692_s13, %s748_s13   ;;  %s660_s12 = sphi %s690_s12, %s747_s12  }
   0x3   : > { %p28_p1 = scmp.ge.s32.totalorder %s26_s15, 2  ;;  %p169_p2 = scmp.lt.s32.totalorder %s668_s14, 3 }
   0x5   : > { %s750_s15 = smov (%p28_p1, %s26_s15), 0  ;;  %p170_p3 = pnand %p548_p0, %p169_p2 }
   0x6   : > { %s549_s18 = sshll.u32 (!%p170_p3), %s660_s12, 3  ;;  %p226_p5 = scmp.lt.s32.totalorder (!%p170_p3), %s660_s12, 1 }
   0x7   : > { %173 = sbr.rel (%p170_p3) target bundleno = 194 (0xc2), region = 28  ;;  %p206_p4 = scmp.lt.s32.totalorder (!%p170_p3), %s549_s18, 15 }
   0xc   : > { %v263_v0 = vld [vmem:[%s744_s1 + $0x10] sm:$0x3]  ;;  %vm312_vm0 = vcmask 1041408   ;;  %s752_s18 = smov (!%p206_p4, %s549_s18), 15  ;;  %v589_v4 = vld [vmem:[%s744_s1 + $0x8] sm:$0xff]  ;;  %v588_v5 = vld [vmem:[%s744_s1] sm:$0xff]  ;;  %v422_v47 = vlaneseq }
   0xd   : > { %v293_v1 = vunpack.c.l.b16 %v263_v0  ;;  %s550_s21 = sshll.u32 %s752_s18, 2  ;;  %vm299_vm1 = vcmask 293888   ;;  %s754_s12 = smov (!%p226_p5, %s660_s12), 1 }
   0xe   : > { %s212_s26 = scalar_lea.vmem %s743_s0, %s550_s21  ;;  %s224_s29 = scalar_lea.vmem %s745_s2, %s550_s21  ;;  %v423_v52 = vshrl.u32 %v422_v47, 7 }
   0xf   : > { %v296_v2 = vpack.c.b16 %v293_v1, %v293_v1  ;;  %v584_v6 = vld [vmem:[%s212_s26] sm:$0xff]  ;;  %v585_v7 = vld [vmem:[%s212_s26 + $0x8] sm:$0xff]  ;;  %v586_v8 = vld [vmem:[%s212_s26 + $0x10] sm:$0xff]  ;;  %s553_s30 = sshll.u32 %s754_s12, 3 }
  0x10   : > { %v587_v9 = vld [vmem:[%s212_s26 + $0x18] sm:$0xff]  ;;  %vm425_vm2 = vcmp.eq.s32.totalorder %v423_v52, 1  ;;  %vm424_vm3 = vcmp.eq.s32.totalorder %v423_v52, 0  ;;  %s229_s6 = scalar_lea.vmem %s746_s3, %s553_s30 }
  0x11   : > { %v314_v3 = vsel %vm312_vm0, %v296_v2, 0 }
  0x12   : > { %321 = vmatpush.bf16.msra.mxu0 %v314_v3  ;;  %613 = vmatpush.bf16.msra.mxu1 %v314_v3 }
  0x13   : > { %614 = vmatpush.bf16.msra.mxu2 %v314_v3  ;;  %615 = vmatpush.bf16.msra.mxu3 %v314_v3 }
  0x16   : > { %322 = vmatpush.bf16.msra.mxu0 %v589_v4  ;;  %616 = vmatpush.bf16.msra.mxu1 %v589_v4 }
  0x17   : > { %617 = vmatpush.bf16.msra.mxu2 %v589_v4  ;;  %618 = vmatpush.bf16.msra.mxu3 %v589_v4 }
  0x1a   : > { %323 = vmatpush.bf16.msra.mxu0 %v588_v5  ;;  %619 = vmatpush.bf16.msra.mxu1 %v588_v5 }
  0x1b   : > { %620 = vmatpush.bf16.msra.mxu2 %v588_v5  ;;  %621 = vmatpush.bf16.msra.mxu3 %v588_v5 }
  0x1d   : > { %578 = vmatmul.msk.bf16.vlgmr.msra.gmra.mxu0 %vm299_vm1, %v584_v6  ;;  %579 = vmatmul.msk.bf16.vlgmr.msra.gmra.mxu1 %vm299_vm1, %v585_v7 }
  0x1e   : > { %580 = vmatmul.msk.bf16.vlgmr.msra.gmra.mxu2 %vm299_vm1, %v586_v8  ;;  %581 = vmatmul.msk.bf16.vlgmr.msra.gmra.mxu3 %vm299_vm1, %v587_v9 }
  0x9a   : > { %v325_v10 = vpop.f32.mrf.mxu0  ;;  %v330_v11 = vpop.f32.mrf.mxu1 }
  0x9b   : > { %v401_v14 = vmul.f32 %v325_v10, %v325_v10  ;;  %v403_v21 = vmul.f32 %v330_v11, %v330_v11 }
  0xa1   : > { %v335_v12 = vpop.f32.mrf.mxu2  ;;  %v340_v13 = vpop.f32.mrf.mxu3 }
  0xa2   : > { %v327_v15 = vpop.f32.mrf.mxu0  ;;  %v332_v16 = vpop.f32.mrf.mxu1  ;;  %v405_v27 = vmul.f32 %v335_v12, %v335_v12  ;;  %v407_v37 = vmul.f32 %v340_v13, %v340_v13 }
  0xa3   : > { %v593_v17 = vpack.c.bf16 %v327_v15, %v325_v10  ;;  %v388_v18 = vadd.f32 %v327_v15, %v325_v10  ;;  %v402_v19 = vmul.f32 %v327_v15, %v327_v15  ;;  %v598_v20 = vpack.c.bf16 %v332_v16, %v330_v11 }
  0xa4   : > { %v404_v25 = vmul.f32 %v332_v16, %v332_v16 }
  0xa5   : > { %594 = vst [vmem:[%s224_s29] sm:$0xff] %v593_v17   ;;  %v409_v22 = vadd.f32 %v402_v19, %v401_v14  ;;  %v389_v23 = vadd.f32 %v388_v18, %v330_v11 }
  0xa6   : > { %610 = vst [vmem:[%s224_s29 + $0x8] sm:$0xff] %v598_v20  }
  0xa7   : > { %v390_v24 = vadd.f32 %v389_v23, %v332_v16  ;;  %v410_v26 = vadd.f32 %v409_v22, %v403_v21 }
  0xa9   : > { %v411_v28 = vadd.f32 %v410_v26, %v404_v25  ;;  %v337_v29 = vpop.f32.mrf.mxu2  ;;  %v391_v30 = vadd.f32 %v390_v24, %v335_v12  ;;  %v342_v31 = vpop.f32.mrf.mxu3 }
  0xaa   : > { %v603_v32 = vpack.c.bf16 %v337_v29, %v335_v12  ;;  %v608_v33 = vpack.c.bf16 %v342_v31, %v340_v13  ;;  %v406_v35 = vmul.f32 %v337_v29, %v337_v29  ;;  %v408_v41 = vmul.f32 %v342_v31, %v342_v31 }
  0xab   : > { %v392_v34 = vadd.f32 %v391_v30, %v337_v29  ;;  %v412_v36 = vadd.f32 %v411_v28, %v405_v27 }
  0xac   : > { %611 = vst [vmem:[%s224_s29 + $0x10] sm:$0xff] %v603_v32  }
  0xad   : > { %v413_v38 = vadd.f32 %v412_v36, %v406_v35  ;;  %612 = vst [vmem:[%s224_s29 + $0x18] sm:$0xff] %v608_v33   ;;  %v393_v39 = vadd.f32 %v392_v34, %v340_v13 }
  0xaf   : > { %v394_v40 = vadd.f32 %v393_v39, %v342_v31  ;;  %v414_v42 = vadd.f32 %v413_v38, %v407_v37 }
  0xb1   : > { %v395_v43 = vrot.slane %v394_v40, 4  ;;  %v415_v44 = vadd.f32 %v414_v42, %v408_v41 }
  0xb3   : > { %v396_v45 = vadd.f32 %v395_v43, %v394_v40  ;;  %v416_v46 = vrot.slane %v415_v44, 4 }
  0xb5   : > { %v397_v48 = vrot.slane %v396_v45, 2  ;;  %v417_v49 = vadd.f32 %v416_v46, %v415_v44 }
  0xb7   : > { %v398_v50 = vadd.f32 %v397_v48, %v396_v45  ;;  %v418_v51 = vrot.slane %v417_v49, 2 }
  0xb9   : > { %v419_v53 = vadd.f32 %v418_v51, %v417_v49  ;;  %v399_v54 = vrot.slane %v398_v50, 1 }
  0xbb   : > { %v420_v55 = vrot.slane %v419_v53, 1  ;;  %v400_v57 = vadd.f32 %v399_v54, %v398_v50 }
  0xbd   : > { %v421_v56 = vadd.f32 %v420_v55, %v419_v53 }
  0xbf   : > { %v426_v58 = vsel %vm425_vm2, %v421_v56, 0.0 }
  0xc0   : > { %v427_v59 = vsel %vm424_vm3, %v400_v57, %v426_v58 }
  0xc1   : > { %428 = vst [vmem:[%s229_s6] sm:$0xff] %v427_v59 }
  0xc2 PF: > { %s14_s14 = sadd.s32 1, %s668_s14   ;;  %s747_s12 = smov %s664_s13 }
  0xc3   : > { %p11_p6 = scmp.ge.s32.totalorder %s14_s14, 4   ;;  %s748_s13 = smov %s750_s15 }
  0xc5   :  { %13 = sbr.rel (!%p11_p6) target bundleno = 2 (0x2), region = 81 }

// kernel: residual_block_forward.6
= control target key start
LH: loop header
LB: loop body
LE: loop exit
PB: predicated region body
PF: predicated region fallthrough
CT: control target
= control target key end

     0   :  { %s385_s12 = smov 0   ;;  %s415_s0 = inlined_call_operand.vmem [shape: bf16[128,128], index: 0, kind: input, shape index: {}]   ;;  %s416_s1 = inlined_call_operand.vmem [shape: f32[1,128], index: 1, kind: input, shape index: {}]   ;;  %s417_s2 = inlined_call_operand.vmem [shape: f32[1,128], index: 2, kind: input, shape index: {}]   ;;  %s418_s3 = inlined_call_operand.vmem [shape: bf16[128,128], index: 3, kind: output, shape index: {}]  }
   0x1 LB: > { %s294_s13 = sadd.s32 4294967295, %s363_s12   ;;  %p298_p0 = scmp.ge.s32.totalorder %s363_s12, 1  ;;  %s363_s12 = sphi %s385_s12, %s13_s12  }
   0x2   : > { %p138_p1 = scmp.lt.s32.totalorder %s363_s12, 3 }
   0x4   : > { %p139_p2 = pnand %p298_p0, %p138_p1 }
   0x5   : > { %s299_s14 = sshll.u32 (!%p139_p2), %s294_s13, 3 }
   0x6   : > { %142 = sbr.rel (%p139_p2) target bundleno = 29 (0x1d), region = 32  ;;  %p163_p3 = scmp.lt.s32.totalorder (!%p139_p2), %s299_s14, 15 }
   0xb   : > { %s420_s14 = smov (!%p163_p3, %s299_s14), 15  ;;  %v355_v0 = vld [vmem:[%s416_s1] ss:$0 sm:$0xff] }
   0xc   : > { %s300_s15 = sshll.u32 %s420_s14, 2  ;;  %v356_v6 = vld [vmem:[%s417_s2] ss:$0 sm:$0xff] }
   0xd   : > { %s166_s18 = scalar_lea.vmem %s415_s0, %s300_s15  ;;  %s172_s25 = scalar_lea.vmem %s418_s3, %s300_s15 }
   0xe   : > { %v306_v1 = vld [vmem:[%s166_s18] sm:$0xff]   ;;  %v341_v2 = vld [vmem:[%s166_s18 + $0x8] sm:$0xff]   ;;  %v342_v3 = vld [vmem:[%s166_s18 + $0x10] sm:$0xff]  }
   0xf   : > { %v307_v4 = vunpack.c.l.bf16 %v306_v1  ;;  %v308_v5 = vunpack.c.h.bf16 %v306_v1  ;;  %v311_v7 = vunpack.c.l.bf16 %v341_v2  ;;  %v312_v8 = vunpack.c.h.bf16 %v341_v2  ;;  %v343_v9 = vld [vmem:[%s166_s18 + $0x18] sm:$0xff]  }
  0x10   : > { %v315_v10 = vunpack.c.l.bf16 %v342_v3  ;;  %v316_v11 = vunpack.c.h.bf16 %v342_v3  ;;  %v319_v12 = vunpack.c.l.bf16 %v343_v9  ;;  %v320_v13 = vunpack.c.h.bf16 %v343_v9 }
  0x11   : > { %v194_v14 = vmul.f32 %v355_v0, %v307_v4  ;;  %v195_v15 = vmul.f32 %v355_v0, %v308_v5  ;;  %v196_v16 = vmul.f32 %v355_v0, %v311_v7  ;;  %v197_v17 = vmul.f32 %v355_v0, %v312_v8 }
  0x12   : > { %v198_v18 = vmul.f32 %v355_v0, %v315_v10  ;;  %v199_v19 = vmul.f32 %v355_v0, %v316_v11  ;;  %v200_v20 = vmul.f32 %v355_v0, %v319_v12  ;;  %v201_v21 = vmul.f32 %v355_v0, %v320_v13 }
  0x13   : > { %v206_v22 = vadd.f32 %v356_v6, %v194_v14  ;;  %v207_v23 = vadd.f32 %v356_v6, %v195_v15  ;;  %v208_v24 = vadd.f32 %v356_v6, %v196_v16  ;;  %v209_v25 = vadd.f32 %v356_v6, %v197_v17 }
  0x14   : > { %v210_v26 = vadd.f32 %v356_v6, %v198_v18  ;;  %v211_v27 = vadd.f32 %v356_v6, %v199_v19  ;;  %v212_v28 = vadd.f32 %v356_v6, %v200_v20  ;;  %v213_v29 = vadd.f32 %v356_v6, %v201_v21 }
  0x15   : > { %v214_v30 = vmax.f32 %v206_v22, 0.0  ;;  %v215_v31 = vmax.f32 %v207_v23, 0.0  ;;  %v216_v32 = vmax.f32 %v208_v24, 0.0  ;;  %v217_v33 = vmax.f32 %v209_v25, 0.0 }
  0x16   : > { %v218_v34 = vmax.f32 %v210_v26, 0.0  ;;  %v219_v35 = vmax.f32 %v211_v27, 0.0  ;;  %v220_v36 = vmax.f32 %v212_v28, 0.0  ;;  %v221_v37 = vmax.f32 %v213_v29, 0.0 }
  0x17   : > { %v324_v38 = vpack.c.bf16 %v215_v31, %v214_v30  ;;  %v329_v39 = vpack.c.bf16 %v217_v33, %v216_v32 }
  0x18   : > { %v334_v40 = vpack.c.bf16 %v219_v35, %v218_v34  ;;  %v339_v41 = vpack.c.bf16 %v221_v37, %v220_v36 }
  0x19   : > { %325 = vst [vmem:[%s172_s25] sm:$0xff] %v324_v38  }
  0x1a   : > { %344 = vst [vmem:[%s172_s25 + $0x8] sm:$0xff] %v329_v39  }
  0x1b   : > { %345 = vst [vmem:[%s172_s25 + $0x10] sm:$0xff] %v334_v40  }
  0x1c   : > { %346 = vst [vmem:[%s172_s25 + $0x18] sm:$0xff] %v339_v41  }
  0x1d PF: > { %s13_s12 = sadd.s32 1, %s363_s12  }
  0x1e   : > { %p10_p4 = scmp.ge.s32.totalorder %s13_s12, 4  }
  0x20   :  { %12 = sbr.rel (!%p10_p4) target bundleno = 1 (0x1), region = 62 }

// kernel: residual_block_forward.7
= control target key start
LH: loop header
LB: loop body
LE: loop exit
PB: predicated region body
PF: predicated region fallthrough
CT: control target
= control target key end

     0   :  { %s722_s12 = smov 0   ;;  %s724_s13 = smov 0   ;;  %s781_s0 = inlined_call_operand.vmem [shape: bf16[128,72], index: 0, kind: input, shape index: {}]   ;;  %s782_s1 = inlined_call_operand.vmem [shape: bf16[72,128], index: 1, kind: input, shape index: {}]   ;;  %s783_s2 = inlined_call_operand.vmem [shape: bf16[128,128], index: 2, kind: output, shape index: {0}]   ;;  %s784_s3 = inlined_call_operand.vmem [shape: f32[16,128], index: 3, kind: output, shape index: {1}]  }
   0x1   :  { %s726_s14 = smov 0  }
   0x2 LB: > { %s26_s15 = sadd.s32 1, %s696_s13  ;;  %p564_p0 = scmp.ge.s32.totalorder %s700_s14, 1  ;;  %s700_s14 = sphi %s726_s14, %s14_s14   ;;  %s696_s13 = sphi %s724_s13, %s786_s13   ;;  %s692_s12 = sphi %s722_s12, %s785_s12  }
   0x3   : > { %p28_p1 = scmp.ge.s32.totalorder %s26_s15, 2  ;;  %p169_p2 = scmp.lt.s32.totalorder %s700_s14, 3 }
   0x5   : > { %s788_s15 = smov (%p28_p1, %s26_s15), 0  ;;  %p170_p3 = pnand %p564_p0, %p169_p2 }
   0x6   : > { %s565_s18 = sshll.u32 (!%p170_p3), %s692_s12, 3  ;;  %p226_p5 = scmp.lt.s32.totalorder (!%p170_p3), %s692_s12, 1 }
   0x7   : > { %173 = sbr.rel (%p170_p3) target bundleno = 202 (0xca), region = 28  ;;  %p206_p4 = scmp.lt.s32.totalorder (!%p170_p3), %s565_s18, 15 }
   0xc   : > { %v267_v0 = vld [vmem:[%s782_s1 + $0x20] sm:$0xf]  ;;  %vm328_vm0 = vcmask 1043456   ;;  %v615_v4 = vld [vmem:[%s782_s1 + $0x18] sm:$0xff]  ;;  %v614_v5 = vld [vmem:[%s782_s1 + $0x10] sm:$0xff]  ;;  %s790_s18 = smov (!%p206_p4, %s565_s18), 15  ;;  %v438_v49 = vlaneseq }
   0xd   : > { %v305_v1 = vunpack.c.l.b16 %v267_v0  ;;  %v613_v6 = vld [vmem:[%s782_s1 + $0x8] sm:$0xff]  ;;  %s566_s25 = sshll.u32 %s790_s18, 2  ;;  %v612_v7 = vld [vmem:[%s782_s1] sm:$0xff]  ;;  %vm315_vm1 = vcmask 588800   ;;  %s792_s12 = smov (!%p226_p5, %s692_s12), 1 }
   0xe   : > { %s212_s30 = scalar_lea.vmem %s781_s0, %s566_s25  ;;  %s224_s6 = scalar_lea.vmem %s783_s2, %s566_s25  ;;  %v439_v54 = vshrl.u32 %v438_v49, 7 }
   0xf   : > { %v310_v2 = vpack.c.b16 %v305_v1, %v305_v1  ;;  %v608_v8 = vld [vmem:[%s212_s30] sm:$0xff]  ;;  %v609_v9 = vld [vmem:[%s212_s30 + $0x8] sm:$0xff]  ;;  %v610_v10 = vld [vmem:[%s212_s30 + $0x10] sm:$0xff]  ;;  %s569_s7 = sshll.u32 %s792_s12, 3 }
  0x10   : > { %v611_v11 = vld [vmem:[%s212_s30 + $0x18] sm:$0xff]  ;;  %vm441_vm2 = vcmp.eq.s32.totalorder %v439_v54, 1  ;;  %vm440_vm3 = vcmp.eq.s32.totalorder %v439_v54, 0  ;;  %s229_s10 = scalar_lea.vmem %s784_s3, %s569_s7 }
  0x11   : > { %v330_v3 = vsel %vm328_vm0, %v310_v2, 0 }
  0x12   : > { %335 = vmatpush.bf16.msra.mxu0 %v330_v3  ;;  %639 = vmatpush.bf16.msra.mxu1 %v330_v3 }
  0x13   : > { %640 = vmatpush.bf16.msra.mxu2 %v330_v3  ;;  %641 = vmatpush.bf16.msra.mxu3 %v330_v3 }
  0x16   : > { %336 = vmatpush.bf16.msra.mxu0 %v615_v4  ;;  %642 = vmatpush.bf16.msra.mxu1 %v615_v4 }
  0x17   : > { %643 = vmatpush.bf16.msra.mxu2 %v615_v4  ;;  %644 = vmatpush.bf16.msra.mxu3 %v615_v4 }
  0x1a   : > { %337 = vmatpush.bf16.msra.mxu0 %v614_v5  ;;  %645 = vmatpush.bf16.msra.mxu1 %v614_v5 }
  0x1b   : > { %646 = vmatpush.bf16.msra.mxu2 %v614_v5  ;;  %647 = vmatpush.bf16.msra.mxu3 %v614_v5 }
  0x1e   : > { %338 = vmatpush.bf16.msra.mxu0 %v613_v6  ;;  %648 = vmatpush.bf16.msra.mxu1 %v613_v6 }
  0x1f   : > { %649 = vmatpush.bf16.msra.mxu2 %v613_v6  ;;  %650 = vmatpush.bf16.msra.mxu3 %v613_v6 }
  0x22   : > { %339 = vmatpush.bf16.msra.mxu0 %v612_v7  ;;  %651 = vmatpush.bf16.msra.mxu1 %v612_v7 }
  0x23   : > { %652 = vmatpush.bf16.msra.mxu2 %v612_v7  ;;  %653 = vmatpush.bf16.msra.mxu3 %v612_v7 }
  0x25   : > { %602 = vmatmul.msk.bf16.vlgmr.msra.gmra.mxu0 %vm315_vm1, %v608_v8  ;;  %603 = vmatmul.msk.bf16.vlgmr.msra.gmra.mxu1 %vm315_vm1, %v609_v9 }
  0x26   : > { %604 = vmatmul.msk.bf16.vlgmr.msra.gmra.mxu2 %vm315_vm1, %v610_v10  ;;  %605 = vmatmul.msk.bf16.vlgmr.msra.gmra.mxu3 %vm315_vm1, %v611_v11 }
  0xa2   : > { %v341_v12 = vpop.f32.mrf.mxu0  ;;  %v346_v13 = vpop.f32.mrf.mxu1 }
  0xa3   : > { %v417_v16 = vmul.f32 %v341_v12, %v341_v12  ;;  %v419_v23 = vmul.f32 %v346_v13, %v346_v13 }
  0xa9   : > { %v351_v14 = vpop.f32.mrf.mxu2  ;;  %v356_v15 = vpop.f32.mrf.mxu3 }
  0xaa   : > { %v343_v17 = vpop.f32.mrf.mxu0  ;;  %v348_v18 = vpop.f32.mrf.mxu1  ;;  %v421_v29 = vmul.f32 %v351_v14, %v351_v14  ;;  %v423_v39 = vmul.f32 %v356_v15, %v356_v15 }
  0xab   : > { %v619_v19 = vpack.c.bf16 %v343_v17, %v341_v12  ;;  %v404_v20 = vadd.f32 %v343_v17, %v341_v12  ;;  %v418_v21 = vmul.f32 %v343_v17, %v343_v17  ;;  %v624_v22 = vpack.c.bf16 %v348_v18, %v346_v13 }
  0xac   : > { %v420_v27 = vmul.f32 %v348_v18, %v348_v18 }
  0xad   : > { %620 = vst [vmem:[%s224_s6] sm:$0xff] %v619_v19   ;;  %v425_v24 = vadd.f32 %v418_v21, %v417_v16  ;;  %v405_v25 = vadd.f32 %v404_v20, %v346_v13 }
  0xae   : > { %636 = vst [vmem:[%s224_s6 + $0x8] sm:$0xff] %v624_v22  }
  0xaf   : > { %v406_v26 = vadd.f32 %v405_v25, %v348_v18  ;;  %v426_v28 = vadd.f32 %v425_v24, %v419_v23 }
  0xb1   : > { %v427_v30 = vadd.f32 %v426_v28, %v420_v27  ;;  %v353_v31 = vpop.f32.mrf.mxu2  ;;  %v407_v32 = vadd.f32 %v406_v26, %v351_v14  ;;  %v358_v33 = vpop.f32.mrf.mxu3 }
  0xb2   : > { %v629_v34 = vpack.c.bf16 %v353_v31, %v351_v14  ;;  %v634_v35 = vpack.c.bf16 %v358_v33, %v356_v15  ;;  %v422_v37 = vmul.f32 %v353_v31, %v353_v31  ;;  %v424_v43 = vmul.f32 %v358_v33, %v358_v33 }
  0xb3   : > { %v408_v36 = vadd.f32 %v407_v32, %v353_v31  ;;  %v428_v38 = vadd.f32 %v427_v30, %v421_v29 }
  0xb4   : > { %637 = vst [vmem:[%s224_s6 + $0x10] sm:$0xff] %v629_v34  }
  0xb5   : > { %v429_v40 = vadd.f32 %v428_v38, %v422_v37  ;;  %638 = vst [vmem:[%s224_s6 + $0x18] sm:$0xff] %v634_v35   ;;  %v409_v41 = vadd.f32 %v408_v36, %v356_v15 }
  0xb7   : > { %v410_v42 = vadd.f32 %v409_v41, %v358_v33  ;;  %v430_v44 = vadd.f32 %v429_v40, %v423_v39 }
  0xb9   : > { %v411_v45 = vrot.slane %v410_v42, 4  ;;  %v431_v46 = vadd.f32 %v430_v44, %v424_v43 }
  0xbb   : > { %v412_v47 = vadd.f32 %v411_v45, %v410_v42  ;;  %v432_v48 = vrot.slane %v431_v46, 4 }
  0xbd   : > { %v413_v50 = vrot.slane %v412_v47, 2  ;;  %v433_v51 = vadd.f32 %v432_v48, %v431_v46 }
  0xbf   : > { %v414_v52 = vadd.f32 %v413_v50, %v412_v47  ;;  %v434_v53 = vrot.slane %v433_v51, 2 }
  0xc1   : > { %v435_v55 = vadd.f32 %v434_v53, %v433_v51  ;;  %v415_v56 = vrot.slane %v414_v52, 1 }
  0xc3   : > { %v436_v57 = vrot.slane %v435_v55, 1  ;;  %v416_v59 = vadd.f32 %v415_v56, %v414_v52 }
  0xc5   : > { %v437_v58 = vadd.f32 %v436_v57, %v435_v55 }
  0xc7   : > { %v442_v60 = vsel %vm441_vm2, %v437_v58, 0.0 }
  0xc8   : > { %v443_v61 = vsel %vm440_vm3, %v416_v59, %v442_v60 }
  0xc9   : > { %444 = vst [vmem:[%s229_s10] sm:$0xff] %v443_v61 }
  0xca PF: > { %s14_s14 = sadd.s32 1, %s700_s14   ;;  %s785_s12 = smov %s696_s13 }
  0xcb   : > { %p11_p6 = scmp.ge.s32.totalorder %s14_s14, 4   ;;  %s786_s13 = smov %s788_s15 }
  0xcd   :  { %13 = sbr.rel (!%p11_p6) target bundleno = 2 (0x2), region = 81 }

// kernel: residual_block_forward.8
= control target key start
LH: loop header
LB: loop body
LE: loop exit
PB: predicated region body
PF: predicated region fallthrough
CT: control target
= control target key end

     0   :  { %s650_s12 = smov 0   ;;  %s652_s13 = smov 0   ;;  %s694_s0 = inlined_call_operand.vmem [shape: bf16[128,4], index: 0, kind: input, shape index: {}]   ;;  %s695_s1 = inlined_call_operand.vmem [shape: bf16[4,128], index: 1, kind: input, shape index: {}]   ;;  %s696_s2 = inlined_call_operand.vmem [shape: bf16[128,128], index: 2, kind: output, shape index: {0}]   ;;  %s697_s3 = inlined_call_operand.vmem [shape: f32[16,128], index: 3, kind: output, shape index: {1}]  }
   0x1   :  { %s654_s14 = smov 0  }
   0x2 LB: > { %s26_s15 = sadd.s32 1, %s624_s13  ;;  %p524_p0 = scmp.ge.s32.totalorder %s628_s14, 1  ;;  %s628_s14 = sphi %s654_s14, %s14_s14   ;;  %s624_s13 = sphi %s652_s13, %s699_s13   ;;  %s620_s12 = sphi %s650_s12, %s698_s12  }
   0x3   : > { %p28_p1 = scmp.ge.s32.totalorder %s26_s15, 2  ;;  %p167_p2 = scmp.lt.s32.totalorder %s628_s14, 3 }
   0x5   : > { %s701_s15 = smov (%p28_p1, %s26_s15), 0  ;;  %p168_p3 = pnand %p524_p0, %p167_p2 }
   0x6   : > { %s525_s18 = sshll.u32 (!%p168_p3), %s620_s12, 3  ;;  %p221_p5 = scmp.lt.s32.totalorder (!%p168_p3), %s620_s12, 1 }
   0x7   : > { %171 = sbr.rel (%p168_p3) target bundleno = 182 (0xb6), region = 28  ;;  %p203_p4 = scmp.lt.s32.totalorder (!%p168_p3), %s525_s18, 15 }
   0xc   : > { %v254_v0 = vld [vmem:[%s695_s1] sm:$0x3]  ;;  %vm288_vm0 = vcmask 1041408   ;;  %s703_s18 = smov (!%p203_p4, %s525_s18), 15  ;;  %vm275_vm1 = vcmask 31744   ;;  %v398_v43 = vlaneseq  ;;  %s705_s12 = smov (!%p221_p5, %s620_s12), 1 }
   0xd   : > { %v290_v1 = vsel %vm288_vm0, %v254_v0, 0  ;;  %s526_s19 = sshll.u32 %s703_s18, 2  ;;  %s529_s26 = sshll.u32 %s705_s12, 3 }
   0xe   : > { %299 = vmatpush.bf16.msra.mxu0 %v290_v1  ;;  %579 = vmatpush.bf16.msra.mxu1 %v290_v1  ;;  %s209_s22 = scalar_lea.vmem %s694_s0, %s526_s19  ;;  %s219_s25 = scalar_lea.vmem %s696_s2, %s526_s19  ;;  %v399_v48 = vshrl.u32 %v398_v43, 7 }
   0xf   : > { %580 = vmatpush.bf16.msra.mxu2 %v290_v1  ;;  %581 = vmatpush.bf16.msra.mxu3 %v290_v1  ;;  %v552_v2 = vld [vmem:[%s209_s22] sm:$0xff]  ;;  %v553_v3 = vld [vmem:[%s209_s22 + $0x8] sm:$0xff]  ;;  %v554_v4 = vld [vmem:[%s209_s22 + $0x10] sm:$0xff]  ;;  %s224_s29 = scalar_lea.vmem %s697_s3, %s529_s26 }
  0x10   : > { %v555_v5 = vld [vmem:[%s209_s22 + $0x18] sm:$0xff]  ;;  %vm401_vm2 = vcmp.eq.s32.totalorder %v399_v48, 1  ;;  %vm400_vm3 = vcmp.eq.s32.totalorder %v399_v48, 0 }
  0x11   : > { %546 = vmatmul.msk.bf16.vlgmr.msra.gmra.mxu0 %vm275_vm1, %v552_v2  ;;  %547 = vmatmul.msk.bf16.vlgmr.msra.gmra.mxu1 %vm275_vm1, %v553_v3 }
  0x12   : > { %548 = vmatmul.msk.bf16.vlgmr.msra.gmra.mxu2 %vm275_vm1, %v554_v4  ;;  %549 = vmatmul.msk.bf16.vlgmr.msra.gmra.mxu3 %vm275_vm1, %v555_v5 }
  0x8e   : > { %v301_v6 = vpop.f32.mrf.mxu0  ;;  %v306_v7 = vpop.f32.mrf.mxu1 }
  0x8f   : > { %v377_v10 = vmul.f32 %v301_v6, %v301_v6  ;;  %v379_v17 = vmul.f32 %v306_v7, %v306_v7 }
  0x95   : > { %v311_v8 = vpop.f32.mrf.mxu2  ;;  %v316_v9 = vpop.f32.mrf.mxu3 }
  0x96   : > { %v303_v11 = vpop.f32.mrf.mxu0  ;;  %v308_v12 = vpop.f32.mrf.mxu1  ;;  %v381_v23 = vmul.f32 %v311_v8, %v311_v8  ;;  %v383_v33 = vmul.f32 %v316_v9, %v316_v9 }
  0x97   : > { %v559_v13 = vpack.c.bf16 %v303_v11, %v301_v6  ;;  %v364_v14 = vadd.f32 %v303_v11, %v301_v6  ;;  %v378_v15 = vmul.f32 %v303_v11, %v303_v11  ;;  %v564_v16 = vpack.c.bf16 %v308_v12, %v306_v7 }
  0x98   : > { %v380_v21 = vmul.f32 %v308_v12, %v308_v12 }
  0x99   : > { %560 = vst [vmem:[%s219_s25] sm:$0xff] %v559_v13   ;;  %v385_v18 = vadd.f32 %v378_v15, %v377_v10  ;;  %v365_v19 = vadd.f32 %v364_v14, %v306_v7 }
  0x9a   : > { %576 = vst [vmem:[%s219_s25 + $0x8] sm:$0xff] %v564_v16  }
  0x9b   : > { %v366_v20 = vadd.f32 %v365_v19, %v308_v12  ;;  %v386_v22 = vadd.f32 %v385_v18, %v379_v17 }
  0x9d   : > { %v387_v24 = vadd.f32 %v386_v22, %v380_v21  ;;  %v313_v25 = vpop.f32.mrf.mxu2  ;;  %v367_v26 = vadd.f32 %v366_v20, %v311_v8  ;;  %v318_v27 = vpop.f32.mrf.mxu3 }
  0x9e   : > { %v569_v28 = vpack.c.bf16 %v313_v25, %v311_v8  ;;  %v574_v29 = vpack.c.bf16 %v318_v27, %v316_v9  ;;  %v382_v31 = vmul.f32 %v313_v25, %v313_v25  ;;  %v384_v37 = vmul.f32 %v318_v27, %v318_v27 }
  0x9f   : > { %v368_v30 = vadd.f32 %v367_v26, %v313_v25  ;;  %v388_v32 = vadd.f32 %v387_v24, %v381_v23 }
  0xa0   : > { %577 = vst [vmem:[%s219_s25 + $0x10] sm:$0xff] %v569_v28  }
  0xa1   : > { %v389_v34 = vadd.f32 %v388_v32, %v382_v31  ;;  %578 = vst [vmem:[%s219_s25 + $0x18] sm:$0xff] %v574_v29   ;;  %v369_v35 = vadd.f32 %v368_v30, %v316_v9 }
  0xa3   : > { %v370_v36 = vadd.f32 %v369_v35, %v318_v27  ;;  %v390_v38 = vadd.f32 %v389_v34, %v383_v33 }
  0xa5   : > { %v371_v39 = vrot.slane %v370_v36, 4  ;;  %v391_v40 = vadd.f32 %v390_v38, %v384_v37 }
  0xa7   : > { %v372_v41 = vadd.f32 %v371_v39, %v370_v36  ;;  %v392_v42 = vrot.slane %v391_v40, 4 }
  0xa9   : > { %v373_v44 = vrot.slane %v372_v41, 2  ;;  %v393_v45 = vadd.f32 %v392_v42, %v391_v40 }
  0xab   : > { %v374_v46 = vadd.f32 %v373_v44, %v372_v41  ;;  %v394_v47 = vrot.slane %v393_v45, 2 }
  0xad   : > { %v395_v49 = vadd.f32 %v394_v47, %v393_v45  ;;  %v375_v50 = vrot.slane %v374_v46, 1 }
  0xaf   : > { %v396_v51 = vrot.slane %v395_v49, 1  ;;  %v376_v53 = vadd.f32 %v375_v50, %v374_v46 }
  0xb1   : > { %v397_v52 = vadd.f32 %v396_v51, %v395_v49 }
  0xb3   : > { %v402_v54 = vsel %vm401_vm2, %v397_v52, 0.0 }
  0xb4   : > { %v403_v55 = vsel %vm400_vm3, %v376_v53, %v402_v54 }
  0xb5   : > { %404 = vst [vmem:[%s224_s29] sm:$0xff] %v403_v55 }
  0xb6 PF: > { %s14_s14 = sadd.s32 1, %s628_s14   ;;  %s698_s12 = smov %s624_s13 }
  0xb7   : > { %p11_p6 = scmp.ge.s32.totalorder %s14_s14, 4   ;;  %s699_s13 = smov %s701_s15 }
  0xb9   :  { %13 = sbr.rel (!%p11_p6) target bundleno = 2 (0x2), region = 81 }

// kernel: residual_block_forward.9
= control target key start
LH: loop header
LB: loop body
LE: loop exit
PB: predicated region body
PF: predicated region fallthrough
CT: control target
= control target key end

     0   :  { %s555_s21 = smov 0   ;;  %s643_s0 = inlined_call_operand.vmem [shape: bf16[128,128], index: 0, kind: input, shape index: {}]   ;;  %s644_s1 = inlined_call_operand.vmem [shape: f32[1,128], index: 1, kind: input, shape index: {}]   ;;  %s645_s2 = inlined_call_operand.vmem [shape: f32[1,128], index: 2, kind: input, shape index: {}]   ;;  %s646_s3 = inlined_call_operand.vmem [shape: bf16[128,128], index: 3, kind: input, shape index: {}]   ;;  %s647_s4 = inlined_call_operand.vmem [shape: f32[1,128], index: 4, kind: input, shape index: {}]   ;;  %s648_s5 = inlined_call_operand.vmem [shape: f32[1,128], index: 5, kind: input, shape index: {}]   ;;  %s649_s6 = inlined_call_operand.vmem [shape: f32[128,128], index: 6, kind: output, shape index: {}]  }
   0x1 LB: > { %s449_s22 = sadd.s32 4294967295, %s518_s21   ;;  %p453_p0 = scmp.ge.s32.totalorder %s518_s21, 1  ;;  %s518_s21 = sphi %s555_s21, %s16_s21  }
   0x2   : > { %p224_p1 = scmp.lt.s32.totalorder %s518_s21, 3 }
   0x4   : > { %p225_p2 = pnand %p453_p0, %p224_p1 }
   0x5   : > { %s454_s23 = sshll.u32 (!%p225_p2), %s449_s22, 3 }
   0x6   : > { %228 = sbr.rel (%p225_p2) target bundleno = 40 (0x28), region = 44  ;;  %p260_p3 = scmp.lt.s32.totalorder (!%p225_p2), %s454_s23, 15 }
   0xb   : > { %s651_s23 = smov (!%p260_p3, %s454_s23), 15  ;;  %v579_v0 = vld [vmem:[%s644_s1] ss:$0 sm:$0xff] }
   0xc   : > { %s455_s24 = sshll.u32 %s651_s23, 2  ;;  %v584_v1 = vld [vmem:[%s647_s4] ss:$0 sm:$0xff]  ;;  %s459_s15 = sshll.u32 %s651_s23, 3 }
   0xd   : > { %s569_s27 = scalar_lea.vmem %s643_s0, %s455_s24  ;;  %s574_s30 = scalar_lea.vmem %s646_s3, %s455_s24  ;;  %v592_v6 = vld [vmem:[%s645_s2] ss:$0 sm:$0xff] }
   0xe   : > { %v463_v2 = vld [vmem:[%s569_s27] sm:$0xff]   ;;  %v494_v4 = vld [vmem:[%s569_s27 + $0x8] sm:$0xff]   ;;  %v495_v15 = vld [vmem:[%s569_s27 + $0x10] sm:$0xff]   ;;  %s623_s18 = scalar_lea.vmem %s649_s6, %s459_s15 }
   0xf   : > { %v479_v3 = vld [vmem:[%s574_s30] sm:$0xff]   ;;  %v464_v5 = vunpack.c.l.bf16 %v463_v2  ;;  %v465_v8 = vunpack.c.h.bf16 %v463_v2  ;;  %v497_v10 = vld [vmem:[%s574_s30 + $0x8] sm:$0xff]   ;;  %v468_v11 = vunpack.c.l.bf16 %v494_v4  ;;  %v469_v13 = vunpack.c.h.bf16 %v494_v4  ;;  %v498_v16 = vld [vmem:[%s574_s30 + $0x10] sm:$0xff]  }
  0x10   : > { %v480_v7 = vunpack.c.l.bf16 %v479_v3  ;;  %v481_v9 = vunpack.c.h.bf16 %v479_v3  ;;  %v484_v12 = vunpack.c.l.bf16 %v497_v10  ;;  %v485_v14 = vunpack.c.h.bf16 %v497_v10  ;;  %v511_v26 = vld [vmem:[%s648_s5] ss:$0 sm:$0xff]  ;;  %v496_v34 = vld [vmem:[%s569_s27 + $0x18] sm:$0xff]  }
  0x11   : > { %v297_v17 = vmul.f32 %v579_v0, %v464_v5  ;;  %v298_v19 = vmul.f32 %v579_v0, %v465_v8  ;;  %v299_v21 = vmul.f32 %v579_v0, %v468_v11  ;;  %v300_v23 = vmul.f32 %v579_v0, %v469_v13  ;;  %v499_v39 = vld [vmem:[%s574_s30 + $0x18] sm:$0xff]  }
  0x12   : > { %v337_v18 = vmul.f32 %v584_v1, %v480_v7  ;;  %v338_v20 = vmul.f32 %v584_v1, %v481_v9  ;;  %v339_v22 = vmul.f32 %v584_v1, %v484_v12  ;;  %v340_v24 = vmul.f32 %v584_v1, %v485_v14 }
  0x13   : > { %v309_v25 = vadd.f32 %v592_v6, %v297_v17  ;;  %v310_v27 = vadd.f32 %v592_v6, %v298_v19  ;;  %v472_v28 = vunpack.c.l.bf16 %v495_v15  ;;  %v488_v29 = vunpack.c.l.bf16 %v498_v16 }
  0x14   : > { %v311_v30 = vadd.f32 %v592_v6, %v299_v21  ;;  %v312_v31 = vadd.f32 %v592_v6, %v300_v23  ;;  %v473_v32 = vunpack.c.h.bf16 %v495_v15  ;;  %v489_v33 = vunpack.c.h.bf16 %v498_v16 }
  0x15   : > { %v345_v35 = vadd.f32 %v337_v18, %v309_v25  ;;  %v346_v36 = vadd.f32 %v338_v20, %v310_v27  ;;  %v301_v37 = vmul.f32 %v579_v0, %v472_v28  ;;  %v341_v38 = vmul.f32 %v584_v1, %v488_v29 }
  0x16   : > { %v347_v40 = vadd.f32 %v339_v22, %v311_v30  ;;  %v348_v41 = vadd.f32 %v340_v24, %v312_v31  ;;  %v302_v42 = vmul.f32 %v579_v0, %v473_v32  ;;  %v342_v43 = vmul.f32 %v584_v1, %v489_v33 }
  0x17   : > { %v357_v44 = vadd.f32 %v511_v26, %v345_v35  ;;  %v358_v45 = vadd.f32 %v511_v26, %v346_v36  ;;  %v313_v46 = vadd.f32 %v592_v6, %v301_v37  ;;  %v476_v47 = vunpack.c.l.bf16 %v496_v34 }
  0x18   : > { %v359_v48 = vadd.f32 %v511_v26, %v347_v40  ;;  %v360_v49 = vadd.f32 %v511_v26, %v348_v41  ;;  %v314_v50 = vadd.f32 %v592_v6, %v302_v42  ;;  %v492_v51 = vunpack.c.l.bf16 %v499_v39 }
  0x19   : > { %v365_v52 = vmax.f32 %v357_v44, 0.0  ;;  %v366_v53 = vmax.f32 %v358_v45, 0.0  ;;  %v349_v54 = vadd.f32 %v341_v38, %v313_v46  ;;  %v303_v55 = vmul.f32 %v579_v0, %v476_v47 }
  0x1a   : > { %v367_v56 = vmax.f32 %v359_v48, 0.0  ;;  %v368_v57 = vmax.f32 %v360_v49, 0.0  ;;  %v350_v58 = vadd.f32 %v342_v43, %v314_v50  ;;  %v343_v59 = vmul.f32 %v584_v1, %v492_v51 }
  0x1b   : > { %373 = vst [vmem:[%s623_s18] sm:$0xff] %v365_v52  ;;  %v361_v60 = vadd.f32 %v511_v26, %v349_v54  ;;  %v315_v61 = vadd.f32 %v592_v6, %v303_v55  ;;  %v477_v62 = vunpack.c.h.bf16 %v496_v34  ;;  %v493_v63 = vunpack.c.h.bf16 %v499_v39 }
  0x1c   : > { %374 = vst [vmem:[%s623_s18 + $0x8] sm:$0xff] %v366_v53  ;;  %v362_v2 = vadd.f32 %v511_v26, %v350_v58 }
  0x1d   : > { %375 = vst [vmem:[%s623_s18 + $0x10] sm:$0xff] %v367_v56  ;;  %v369_v3 = vmax.f32 %v361_v60, 0.0  ;;  %v351_v4 = vadd.f32 %v343_v59, %v315_v61  ;;  %v304_v5 = vmul.f32 %v579_v0, %v477_v62  ;;  %v344_v7 = vmul.f32 %v584_v1, %v493_v63 }
  0x1e   : > { %376 = vst [vmem:[%s623_s18 + $0x18] sm:$0xff] %v368_v57  ;;  %v370_v8 = vmax.f32 %v362_v2, 0.0 }
  0x1f   : > { %377 = vst [vmem:[%s623_s18 + $0x20] sm:$0xff] %v369_v3  ;;  %v363_v9 = vadd.f32 %v511_v26, %v351_v4  ;;  %v316_v10 = vadd.f32 %v592_v6, %v304_v5 }
  0x20   : > { %378 = vst [vmem:[%s623_s18 + $0x28] sm:$0xff] %v370_v8 }
  0x21   : > { %v371_v11 = vmax.f32 %v363_v9, 0.0  ;;  %v352_v12 = vadd.f32 %v344_v7, %v316_v10 }
  0x23   : > { %379 = vst [vmem:[%s623_s18 + $0x30] sm:$0xff] %v371_v11  ;;  %v364_v13 = vadd.f32 %v511_v26, %v352_v12 }
  0x25   : > { %v372_v14 = vmax.f32 %v364_v13, 0.0 }
  0x27   : > { %380 = vst [vmem:[%s623_s18 + $0x38] sm:$0xff] %v372_v14 }
  0x28 PF: > { %s16_s21 = sadd.s32 1, %s518_s21  }
  0x29   : > { %p13_p4 = scmp.ge.s32.totalorder %s16_s21, 4  }
  0x2b   :  { %15 = sbr.rel (!%p13_p4) target bundleno = 1 (0x1), region = 77 }

</bundles_post_ra>
